<compile_context>
chip_gen: v6e
topology: v6e:2x2x1
jax: 0.10.0
libtpu: 0.0.40
codegen_flags: <defaults>
</compile_context>

<pallas_src>
import jax
import jax.numpy as jnp
from jax.experimental import pallas as pl
from jax.experimental.pallas import tpu as pltpu

EMB_DIM = 512


def _pick_k_tile(d_in: int) -> int:
    """Largest convenient K tile that evenly divides d_in (keeps blocks 128-aligned)."""
    for tk in (2048, 1024, 512, 256, 128):
        if d_in % tk == 0:
            return tk
    return d_in  # small / odd d_in: single block


def _fused_siamese_kernel(x1_ref, x2_ref, w_ref, mask_ref, fcw_ref, b_ref,
                          o_ref, acc1_ref, acc2_ref):
    """Grid axis 0 = K-reduction over the projection. Output resident across it."""
    k = pl.program_id(0)

    @pl.when(k == 0)
    def _():
        acc1_ref[...] = jnp.zeros_like(acc1_ref)
        acc2_ref[...] = jnp.zeros_like(acc2_ref)

    w = w_ref[...]  # (tk, EMB_DIM) bf16, loaded once per K step, shared by both images
    acc1_ref[...] += jnp.dot(x1_ref[...], w, preferred_element_type=jnp.float32)
    acc2_ref[...] += jnp.dot(x2_ref[...], w, preferred_element_type=jnp.float32)

    @pl.when(k == pl.num_programs(0) - 1)
    def _():
        e1 = acc1_ref[...]
        e2 = acc2_ref[...]
        # F.normalize(x, p=2, dim=1): rsqrt goes to the EUP (free slot), no VPU divide.
        e1 = e1 * jax.lax.rsqrt(
            jnp.maximum(jnp.sum(e1 * e1, axis=-1, keepdims=True), 1e-24))
        e2 = e2 * jax.lax.rsqrt(
            jnp.maximum(jnp.sum(e2 * e2, axis=-1, keepdims=True), 1e-24))

        # |e1 - e2| -> (inverted) dropout via a pre-scaled mask (1/keep or 0).
        diff = jnp.abs(e1 - e2) * mask_ref[...]

        # fc: (512 -> 1) as VPU multiply + lane reduce; avoids a lane-sparse
        # (512,1) MXU matmul. Bias comes from SMEM as a scalar.
        logits = jnp.sum(diff * fcw_ref[...], axis=-1, keepdims=True) + b_ref[0]
        o_ref[...] = logits.astype(o_ref.dtype)


def siamese_forward(x1, x2, w_proj, fc_w, fc_b, *, rate=0.5, training=False,
                    rng=None):
    """Full SiameseNeuralNetwork.forward for NCHW inputs x1, x2."""
    B = x1.shape[0]
    d_in = w_proj.shape[0]

    # bf16 operands for the MXU; accumulation stays f32 inside the kernel.
    x1f = x1.reshape(B, -1).astype(jnp.bfloat16)
    x2f = x2.reshape(B, -1).astype(jnp.bfloat16)
    w_bf = w_proj.astype(jnp.bfloat16)

    fcw = fc_w.reshape(1, EMB_DIM).astype(jnp.float32)   # keep (1, 512): lane-dense
    bias = fc_b.reshape(1).astype(jnp.float32)            # SMEM scalar

    if training and rate > 0.0:
        if rng is None:
            rng = jax.random.PRNGKey(0)
        keep_prob = 1.0 - float(rate)
        # TODO(synk): mask statistics match nn.Dropout but the RNG stream differs
        #             from torch, so training-mode values won't match bit-for-bit.
        mask = (jax.random.bernoulli(rng, keep_prob, (B, EMB_DIM))
                .astype(jnp.float32) / keep_prob)
    else:
        mask = jnp.ones((B, EMB_DIM), jnp.float32)

    tk = _pick_k_tile(d_in)
    n_k = d_in // tk

    return pl.pallas_call(
        _fused_siamese_kernel,
        out_shape=jax.ShapeDtypeStruct((B, 1), jnp.float32),
        grid=(n_k,),
        in_specs=[
            pl.BlockSpec((B, tk), lambda k: (0, k)),          # x1 flat, K-tiled
            pl.BlockSpec((B, tk), lambda k: (0, k)),          # x2 flat, K-tiled
            pl.BlockSpec((tk, EMB_DIM), lambda k: (k, 0)),    # w_proj, K-tiled
            pl.BlockSpec((B, EMB_DIM), lambda k: (0, 0)),     # dropout mask
            pl.BlockSpec((1, EMB_DIM), lambda k: (0, 0)),     # fc weight row
            pl.BlockSpec(memory_space=pltpu.MemorySpace.SMEM),  # fc bias scalar
        ],
        out_specs=pl.BlockSpec((B, 1), lambda k: (0, 0)),
        scratch_shapes=[
            pltpu.VMEM((B, EMB_DIM), jnp.float32),  # embedding accumulator 1
            pltpu.VMEM((B, EMB_DIM), jnp.float32),  # embedding accumulator 2
        ],
        compiler_params=pltpu.CompilerParams(
            dimension_semantics=("arbitrary",)),
    )(x1f, x2f, w_bf, mask, fcw, bias)


def _reference_forward(x1, x2, w_proj, fc_w, fc_b, mask):
    """Pure-JAX reference (same bf16 operand cast) for a sanity check."""
    B = x1.shape[0]

    def emb(x):
        e = jnp.dot(x.reshape(B, -1).astype(jnp.bfloat16),
                    w_proj.astype(jnp.bfloat16),
                    preferred_element_type=jnp.float32)
        return e * jax.lax.rsqrt(
            jnp.maximum(jnp.sum(e * e, axis=-1, keepdims=True), 1e-24))

    diff = jnp.abs(emb(x1) - emb(x2)) * mask
    return diff @ fc_w.reshape(1, EMB_DIM).T.astype(jnp.float32) + fc_b.astype(jnp.float32)


if __name__ == "__main__":
    key = jax.random.PRNGKey(0)
    k1, k2, kw, kfw, kfb, kdrop = jax.random.split(key, 6)

    B, C, H, W = 2, 3, 16, 16
    x1 = jax.random.normal(k1, (B, C, H, W), dtype=jnp.float32)
    x2 = jax.random.normal(k2, (B, C, H, W), dtype=jnp.float32)

    d_in = C * H * W  # 768
    # Deterministic synthetic parameters (no checkpoint loading).
    w_proj = jax.random.normal(kw, (d_in, EMB_DIM), dtype=jnp.float32) / jnp.sqrt(d_in)
    fc_w = jax.random.normal(kfw, (1, EMB_DIM), dtype=jnp.float32) / jnp.sqrt(EMB_DIM)
    fc_b = jax.random.normal(kfb, (1,), dtype=jnp.float32)

    # Eval-mode forward (dropout = identity).
    out_eval = siamese_forward(x1, x2, w_proj, fc_w, fc_b, rate=0.5, training=False)
    # Training-mode forward (jax.random dropout mask).
    out_train = siamese_forward(x1, x2, w_proj, fc_w, fc_b, rate=0.5,
                                training=True, rng=kdrop)
    jax.block_until_ready((out_eval, out_train))

    assert out_eval.shape == (B, 1) and out_eval.dtype == jnp.float32
    assert out_train.shape == (B, 1) and out_train.dtype == jnp.float32
    assert bool(jnp.all(jnp.isfinite(out_eval))) and bool(jnp.all(jnp.isfinite(out_train)))

    # Sanity-check the fused kernel against a plain-JAX reference (eval path).
    ref_eval = _reference_forward(x1, x2, w_proj, fc_w, fc_b,
                                  jnp.ones((B, EMB_DIM), jnp.float32))
    assert bool(jnp.allclose(out_eval, ref_eval, rtol=2e-2, atol=2e-2))

    print("KERNEL_OK")
</pallas_src>

<mosaic_0001>
module attributes {stable_mosaic.version = 11 : i64} {
  func.func @_fused_siamese_kernel(%arg0: i32, %arg1: memref<2x256xbf16, #tpu.memory_space<vmem>>, %arg2: memref<2x256xbf16, #tpu.memory_space<vmem>>, %arg3: memref<256x512xbf16, #tpu.memory_space<vmem>>, %arg4: memref<2x512xf32, #tpu.memory_space<vmem>>, %arg5: memref<1x512xf32, #tpu.memory_space<vmem>>, %arg6: memref<1xf32, #tpu.memory_space<smem>>, %arg7: memref<2x1xf32, #tpu.memory_space<vmem>>, %arg8: memref<2x512xf32, #tpu.memory_space<vmem>>, %arg9: memref<2x512xf32, #tpu.memory_space<vmem>>) attributes {dimension_semantics = [#tpu.dimension_semantics<arbitrary>], iteration_bounds = array<i64: 3>, scalar_prefetch = 0 : i64, scratch_operands = 2 : i64, tpu.core_type = #tpu.core_type<tc>, window_params = [{transform_indices = @transform_0, window_bounds = array<i64: 2, 256>}, {transform_indices = @transform_1, window_bounds = array<i64: 2, 256>}, {transform_indices = @transform_2, window_bounds = array<i64: 256, 512>}, {pipeline_mode = #tpu.pipeline_mode<synchronous>, transform_indices = @transform_3, window_bounds = array<i64: 2, 512>}, {pipeline_mode = #tpu.pipeline_mode<synchronous>, transform_indices = @transform_4, window_bounds = array<i64: 1, 512>}, {transform_indices = @transform_5, window_bounds = array<i64: 1>}, {pipeline_mode = #tpu.pipeline_mode<synchronous>, transform_indices = @transform_6, window_bounds = array<i64: 2, 1>}]} {
    %c0_i32 = arith.constant 0 : i32
    %0 = arith.cmpi eq, %arg0, %c0_i32 : i32
    %1 = arith.extui %0 : i1 to i32
    %c0_i32_0 = arith.constant 0 : i32
    %2 = arith.cmpi ne, %1, %c0_i32_0 : i32
    scf.if %2 {
      %cst_16 = arith.constant 0.000000e+00 : f32
      %17 = vector.broadcast %cst_16 : f32 to vector<2x512xf32>
      %c0_17 = arith.constant 0 : index
      %c0_18 = arith.constant 0 : index
      %18 = vector.load %arg8[%c0_17, %c0_18] : memref<2x512xf32, #tpu.memory_space<vmem>>, vector<2x512xf32>
      tpu.vector_store %arg8[%c0_17, %c0_18], %17 {strides = array<i32>} : memref<2x512xf32, #tpu.memory_space<vmem>>, vector<2x512xf32>,
      %cst_19 = arith.constant 0.000000e+00 : f32
      %19 = vector.broadcast %cst_19 : f32 to vector<2x512xf32>
      %c0_20 = arith.constant 0 : index
      %c0_21 = arith.constant 0 : index
      %20 = vector.load %arg9[%c0_20, %c0_21] : memref<2x512xf32, #tpu.memory_space<vmem>>, vector<2x512xf32>
      tpu.vector_store %arg9[%c0_20, %c0_21], %19 {strides = array<i32>} : memref<2x512xf32, #tpu.memory_space<vmem>>, vector<2x512xf32>,
    } else {
    }
    %c0 = arith.constant 0 : index
    %c0_1 = arith.constant 0 : index
    %3 = vector.load %arg3[%c0, %c0_1] : memref<256x512xbf16, #tpu.memory_space<vmem>>, vector<256x512xbf16>
    %c0_2 = arith.constant 0 : index
    %c0_3 = arith.constant 0 : index
    %4 = vector.load %arg8[%c0_2, %c0_3] : memref<2x512xf32, #tpu.memory_space<vmem>>, vector<2x512xf32>
    %c0_4 = arith.constant 0 : index
    %c0_5 = arith.constant 0 : index
    %5 = vector.load %arg1[%c0_4, %c0_5] : memref<2x256xbf16, #tpu.memory_space<vmem>>, vector<2x256xbf16>
    %cst = arith.constant dense<0.000000e+00> : vector<2x512xf32>
    %6 = tpu.matmul %5, %3, %cst {dimension_numbers = #tpu.dot_dimension_numbers<[1], [0], [0], [1], [0, 0, 1, 1], [], []>} : vector<2x256xbf16>, vector<256x512xbf16>, vector<2x512xf32> -> vector<2x512xf32>
    %7 = arith.addf %4, %6 : vector<2x512xf32>
    %c0_6 = arith.constant 0 : index
    %c0_7 = arith.constant 0 : index
    %8 = vector.load %arg8[%c0_6, %c0_7] : memref<2x512xf32, #tpu.memory_space<vmem>>, vector<2x512xf32>
    tpu.vector_store %arg8[%c0_6, %c0_7], %7 {strides = array<i32>} : memref<2x512xf32, #tpu.memory_space<vmem>>, vector<2x512xf32>,
    %c0_8 = arith.constant 0 : index
    %c0_9 = arith.constant 0 : index
    %9 = vector.load %arg9[%c0_8, %c0_9] : memref<2x512xf32, #tpu.memory_space<vmem>>, vector<2x512xf32>
    %c0_10 = arith.constant 0 : index
    %c0_11 = arith.constant 0 : index
    %10 = vector.load %arg2[%c0_10, %c0_11] : memref<2x256xbf16, #tpu.memory_space<vmem>>, vector<2x256xbf16>
    %cst_12 = arith.constant dense<0.000000e+00> : vector<2x512xf32>
    %11 = tpu.matmul %10, %3, %cst_12 {dimension_numbers = #tpu.dot_dimension_numbers<[1], [0], [0], [1], [0, 0, 1, 1], [], []>} : vector<2x256xbf16>, vector<256x512xbf16>, vector<2x512xf32> -> vector<2x512xf32>
    %12 = arith.addf %9, %11 : vector<2x512xf32>
    %c0_13 = arith.constant 0 : index
    %c0_14 = arith.constant 0 : index
    %13 = vector.load %arg9[%c0_13, %c0_14] : memref<2x512xf32, #tpu.memory_space<vmem>>, vector<2x512xf32>
    tpu.vector_store %arg9[%c0_13, %c0_14], %12 {strides = array<i32>} : memref<2x512xf32, #tpu.memory_space<vmem>>, vector<2x512xf32>,
    %c2_i32 = arith.constant 2 : i32
    %14 = arith.cmpi eq, %arg0, %c2_i32 : i32
    %15 = arith.extui %14 : i1 to i32
    %c0_i32_15 = arith.constant 0 : i32
    %16 = arith.cmpi ne, %15, %c0_i32_15 : i32
    scf.if %16 {
      %c0_16 = arith.constant 0 : index
      %c0_17 = arith.constant 0 : index
      %17 = vector.load %arg8[%c0_16, %c0_17] : memref<2x512xf32, #tpu.memory_space<vmem>>, vector<2x512xf32>
      %c0_18 = arith.constant 0 : index
      %c0_19 = arith.constant 0 : index
      %18 = vector.load %arg9[%c0_18, %c0_19] : memref<2x512xf32, #tpu.memory_space<vmem>>, vector<2x512xf32>
      %19 = arith.mulf %17, %17 : vector<2x512xf32>
      %cst_20 = arith.constant dense<0.000000e+00> : vector<2xf32>
      %20 = vector.multi_reduction <add>, %19, %cst_20 [1] : vector<2x512xf32> to vector<2xf32>
      %21 = vector.shape_cast %20 : vector<2xf32> to vector<2x1xf32>
      %cst_21 = arith.constant 1.000000e-24 : f32
      %22 = vector.broadcast %cst_21 : f32 to vector<2x1xf32>
      %23 = arith.maximumf %21, %22 : vector<2x1xf32>
      %24 = math.rsqrt %23 : vector<2x1xf32>
      %25 = vector.broadcast %24 : vector<2x1xf32> to vector<2x512xf32>
      %26 = arith.mulf %17, %25 : vector<2x512xf32>
      %27 = arith.mulf %18, %18 : vector<2x512xf32>
      %cst_22 = arith.constant dense<0.000000e+00> : vector<2xf32>
      %28 = vector.multi_reduction <add>, %27, %cst_22 [1] : vector<2x512xf32> to vector<2xf32>
      %29 = vector.shape_cast %28 : vector<2xf32> to vector<2x1xf32>
      %cst_23 = arith.constant 1.000000e-24 : f32
      %30 = vector.broadcast %cst_23 : f32 to vector<2x1xf32>
      %31 = arith.maximumf %29, %30 : vector<2x1xf32>
      %32 = math.rsqrt %31 : vector<2x1xf32>
      %33 = vector.broadcast %32 : vector<2x1xf32> to vector<2x512xf32>
      %34 = arith.mulf %18, %33 : vector<2x512xf32>
      %35 = arith.subf %26, %34 : vector<2x512xf32>
      %36 = math.absf %35 : vector<2x512xf32>
      %c0_24 = arith.constant 0 : index
      %c0_25 = arith.constant 0 : index
      %37 = vector.load %arg4[%c0_24, %c0_25] : memref<2x512xf32, #tpu.memory_space<vmem>>, vector<2x512xf32>
      %38 = arith.mulf %36, %37 : vector<2x512xf32>
      %c0_26 = arith.constant 0 : index
      %c0_27 = arith.constant 0 : index
      %39 = vector.load %arg5[%c0_26, %c0_27] : memref<1x512xf32, #tpu.memory_space<vmem>>, vector<1x512xf32>
      %40 = vector.broadcast %39 : vector<1x512xf32> to vector<2x512xf32>
      %41 = arith.mulf %38, %40 : vector<2x512xf32>
      %cst_28 = arith.constant dense<0.000000e+00> : vector<2xf32>
      %42 = vector.multi_reduction <add>, %41, %cst_28 [1] : vector<2x512xf32> to vector<2xf32>
      %43 = vector.shape_cast %42 : vector<2xf32> to vector<2x1xf32>
      %c0_29 = arith.constant 0 : index
      %44 = memref.load %arg6[%c0_29] : memref<1xf32, #tpu.memory_space<smem>>
      %45 = vector.broadcast %44 : f32 to vector<2x1xf32>
      %46 = arith.addf %43, %45 : vector<2x1xf32>
      %c0_30 = arith.constant 0 : index
      %c0_31 = arith.constant 0 : index
      %47 = vector.load %arg7[%c0_30, %c0_31] : memref<2x1xf32, #tpu.memory_space<vmem>>, vector<2x1xf32>
      tpu.vector_store %arg7[%c0_30, %c0_31], %46 {strides = array<i32>} : memref<2x1xf32, #tpu.memory_space<vmem>>, vector<2x1xf32>,
    } else {
    }
    return
  }
  func.func @transform_0(%arg0: i32) -> (i32, i32) {
    %c0_i32 = arith.constant 0 : i32
    %c0_i32_0 = arith.constant 0 : i32
    return %c0_i32, %arg0 : i32, i32
  }
  func.func @transform_1(%arg0: i32) -> (i32, i32) {
    %c0_i32 = arith.constant 0 : i32
    %c0_i32_0 = arith.constant 0 : i32
    return %c0_i32, %arg0 : i32, i32
  }
  func.func @transform_2(%arg0: i32) -> (i32, i32) {
    %c0_i32 = arith.constant 0 : i32
    %c0_i32_0 = arith.constant 0 : i32
    return %arg0, %c0_i32 : i32, i32
  }
  func.func @transform_3(%arg0: i32) -> (i32, i32) {
    %c0_i32 = arith.constant 0 : i32
    %c0_i32_0 = arith.constant 0 : i32
    %c0_i32_1 = arith.constant 0 : i32
    return %c0_i32, %c0_i32_0 : i32, i32
  }
  func.func @transform_4(%arg0: i32) -> (i32, i32) {
    %c0_i32 = arith.constant 0 : i32
    %c0_i32_0 = arith.constant 0 : i32
    %c0_i32_1 = arith.constant 0 : i32
    return %c0_i32, %c0_i32_0 : i32, i32
  }
  func.func @transform_5(%arg0: i32) -> i32 {
    %c0_i32 = arith.constant 0 : i32
    %c0_i32_0 = arith.constant 0 : i32
    return %c0_i32 : i32
  }
  func.func @transform_6(%arg0: i32) -> (i32, i32) {
    %c0_i32 = arith.constant 0 : i32
    %c0_i32_0 = arith.constant 0 : i32
    %c0_i32_1 = arith.constant 0 : i32
    return %c0_i32, %c0_i32_0 : i32, i32
  }
}

</mosaic_0001>

<bundles_post_ra>
// kernel: tpu_custom_call.1
= control target key start
LH: loop header
LB: loop body
LE: loop exit
PB: predicated region body
PF: predicated region fallthrough
CT: control target
= control target key end

     0   :  { %s2317_s0 = inlined_call_operand.hbm [shape: bf16[2,768], index: 0, kind: input, shape index: {}]   ;;  %s2318_s1 = inlined_call_operand.hbm [shape: bf16[2,768], index: 1, kind: input, shape index: {}]   ;;  %s2319_s2 = inlined_call_operand.hbm [shape: bf16[768,512], index: 2, kind: input, shape index: {}]   ;;  %s2320_s3 = inlined_call_operand.hbm [shape: f32[2,512], index: 3, kind: input, shape index: {}]   ;;  %s2321_s4 = inlined_call_operand.vmem [shape: f32[1,512], index: 4, kind: input, shape index: {}]   ;;  %s2322_s5 = inlined_call_operand.<no memory space> [shape: f32[1], index: 5, kind: input, shape index: {}]   ;;  %s2323_s6 = inlined_call_operand.vmem [shape: f32[2,1], index: 6, kind: output, shape index: {}]  }
   0x1   :  { %2336 = sst [smem:[#allocation23_spill]] %s2318_s1 }
   0x2   :  { %11 = sst [smem:[#allocation4]] %s2322_s5 }
   0x3   :  { %12 = vsyncpa [#allocation6], 0 }
   0x4   :  { %14 = vsyncpa [#allocation6 + $0x1], 0 }
   0x5   :  { %15 = vsyncpa [#allocation8], 0 }
   0x6   :  { %17 = vsyncpa [#allocation8 + $0x1], 0 }
   0x7   :  { %18 = vsyncpa [#allocation11], 0  ;;  %s1729_s23 = smov 0   ;;  %s1731_s24 = smov 0  }
   0x8   :  { %s1733_s25 = smov 0   ;;  %s1735_s26 = smov 0  }
   0x9 LB: > { %s1750_s5 = sadd.s32 1, %s1679_s26   ;;  %s31_s27 = sadd.s32 1, %s1675_s25  ;;  %s1679_s26 = sphi %s1735_s26, %s2369_s26   ;;  %s1675_s25 = sphi %s1733_s25, %s2368_s25   ;;  %s1671_s24 = sphi %s1731_s24, %s2367_s24   ;;  %s1667_s23 = sphi %s1729_s23, %s2366_s23  }
   0xa   : > { %s28_s28 = ssub.s32 %s1679_s26, %s1750_s5  ;;  %p38_p0 = scmp.ne.s32.totalorder %s1675_s25, %s1671_s24 }
   0xb   : > { %p29_p1 = scmp.eq.s32.totalorder %s28_s28, 0  ;;  %p39_p2 = scmp.eq.s32.totalorder %s1679_s26, 0 }
   0xc   : > { %p1386_p3 = scmp.lt.s32.totalorder %s1679_s26, 3  ;;  %s1763_s30 = sand.u32 1, %s1675_s25  }
   0xd   : > { %s1760_s29 = scalar_select %p29_p1, %s1675_s25, %s31_s27  }
   0xe   : > { %p40_p4 = por %p39_p2, %p38_p0  ;;  %s1272_s7 = sshll.u32 %s1763_s30, 1 }
   0xf   : > { %2337 = sst [smem:[#allocation15_spill]] %s1760_s29  ;;  %s1357_s8 = sshll.u32 %s1679_s26, 5 }
  0x10   : > { %p1767_p5 = pnand %p1386_p3, %p40_p4  ;;  %s240_s10 = sand.u32 1, %s1679_s26  }
  0x11   : > { %s2339_s1 = sld [smem:[#allocation23_spill]]  ;;  %s244_s14 = scalar_lea.vmem [#allocation7], %s1272_s7 }
  0x12   : > { %s252_s15 = sshll.u32 %s244_s14, 4  ;;  %s1278_s16 = sshll.u32 %s1763_s30, 9  ;;  %s253_s15 = int_to_ptr.vmem [resolvable:$true] %s252_s15 }
  0x13   : > { %s1782_s17 = scalar_lea.sflag [#allocation8], %s240_s10  ;;  %p1788_p7 = pneg %p1767_p5 }
  0x17   : > { %s1777_s13 = scalar_lea.hbm %s2339_s1, %s1357_s8  ;;  %s1532_s22 = scalar_lea.hbm %s2339_s1, 96 }
  0x18   : > { %s1527_s18 = scalar_lea.hbm %s1777_s13, 32  ;;  %p1533_p10 = scmp.lt.s32.totalorder %s1777_s13, %s2339_s1 }
  0x19   : > { %p1528_p6 = scmp.ne.s32.totalorder %s1777_s13, %s1527_s18  ;;  %p1534_p11 = scmp.lt.s32.totalorder %s1532_s22, %s1527_s18 }
  0x1b   : > { %p1530_p8 = pnand %p1788_p7, %p1528_p6  ;;  %p1535_p12 = por %p1534_p11, %p1533_p10 }
  0x1d   : > { %p1531_p9 = pneg %p1530_p8 }
  0x1f   : > { %p1536_p13 = pnand %p1535_p12, %p1531_p9 }
  0x21   : > { %1539 = shalt.err (!%p1536_p13)
}
  0x22   : > { %s1540_s10 = scalar_lea.vmem %s253_s15, 32  ;;  %s1681_s11 = smov [#allocation7]  }
  0x23   : > { %p1541_p0 = scmp.ne.s32.totalorder %s253_s15, %s1540_s10  ;;  %s1545_s12 = sshll.u32 %s1681_s11, 4  ;;  %s1546_s12 = int_to_ptr.vmem [resolvable:$false] %s1545_s12 }
  0x24   : > { %s1547_s14 = scalar_lea.vmem %s1546_s12, 64  ;;  %p1548_p3 = scmp.lt.s32.totalorder %s253_s15, %s1546_s12 }
  0x25   : > { %p1543_p1 = pnand %p1541_p0, %p1788_p7  ;;  %p1549_p4 = scmp.lt.s32.totalorder %s1547_s14, %s1540_s10 }
  0x27   : > { %p1544_p2 = pneg %p1543_p1  ;;  %p1550_p6 = por %p1549_p4, %p1548_p3 }
  0x29   : > { %p1551_p8 = pnand %p1550_p6, %p1544_p2 }
  0x2b   : > { %1554 = shalt.err (!%p1551_p8)
}
  0x2c   : > { %1381 = dma.hbm_to_vmem [thread:$0]  (!%p1767_p5), %s1777_s13, 32, %s253_s15, %s1782_s17  }
  0x2d   : > { %s263_s18 = scalar_lea.vmem [#allocation9], %s1278_s16  ;;  %s1812_s21 = sadd.s32 4294967295, %s1679_s26  }
  0x2e   : > { %s271_s20 = sshll.u32 %s263_s18, 4  ;;  %p44_p9 = scmp.ne.s32.totalorder %s1671_s24, %s1667_s23  ;;  %s1809_s20 = int_to_ptr.vmem [resolvable:$true] %s271_s20 }
  0x2f   : > { %p2324_p10 = scmp.eq.s32.totalorder %s1812_s21, 0  ;;  %p1269_p11 = scmp.ge.s32.totalorder %s1679_s26, 1 }
  0x30   : > { %p191_p12 = scmp.lt.s32.totalorder %s1679_s26, 4  ;;  %s1682_s16 = smov [#allocation10]  }
  0x31   : > { %p1822_p0 = por %p2324_p10, %p44_p9  ;;  %s204_s22 = sshll.u32 %s1682_s16, 4  ;;  %s1830_s22 = int_to_ptr.vmem [resolvable:$true] %s204_s22 }
  0x32   : > { %p1826_p1 = pnand %p1269_p11, %p191_p12  ;;  %s1839_s28 = scalar_lea.hbm %s2317_s0, %s1357_s8 }
  0x33   : > { %s2341_s13 = scalar_select %p1822_p0, 1, 0 }
  0x34   : > { %s2342_s15 = scalar_select %p1826_p1, 1, 0 }
  0x35   : > { %p1371_p2 = pneg %p1826_p1  ;;  %s225_s10 = scalar_lea.vmem [#allocation5], %s1272_s7 }
  0x36   : > { %s233_s11 = sshll.u32 %s225_s10, 4  ;;  %s222_s14 = scalar_lea.sflag [#allocation6], %s1763_s30  ;;  %s234_s11 = int_to_ptr.vmem [resolvable:$true] %s233_s11 }
  0x37   : > { %p1845_p3 = pnand %p1371_p2, %p2324_p10  ;;  %s1555_s18 = scalar_lea.hbm %s1839_s28, 32 }
  0x38   : > { %p1556_p4 = scmp.ne.s32.totalorder %s1839_s28, %s1555_s18  ;;  %s1560_s23 = scalar_lea.hbm %s2317_s0, 96 }
  0x39   : > { %s2343_s12 = scalar_select %p1845_p3, 1, 0 }
  0x3a   : > { %p1558_p6 = pnand %p1556_p4, %p1788_p7  ;;  %p1561_p9 = scmp.lt.s32.totalorder %s1839_s28, %s2317_s0 }
  0x3b   : > { %p1562_p11 = scmp.lt.s32.totalorder %s1560_s23, %s1555_s18 }
  0x3c   : > { %p1559_p8 = pneg %p1558_p6 }
  0x3d   : > { %p1563_p12 = por %p1562_p11, %p1561_p9 }
  0x3f   : > { %p1564_p2 = pnand %p1563_p12, %p1559_p8 }
  0x41   : > { %1567 = shalt.err (!%p1564_p2)
}
  0x42   : > { %s1568_s7 = scalar_lea.vmem %s234_s11, 32  ;;  %s1683_s30 = smov [#allocation5]  }
  0x43   : > { %p1569_p13 = scmp.ne.s32.totalorder %s234_s11, %s1568_s7  ;;  %s1573_s10 = sshll.u32 %s1683_s30, 4  ;;  %s1574_s10 = int_to_ptr.vmem [resolvable:$false] %s1573_s10 }
  0x44   : > { %s1575_s29 = scalar_lea.vmem %s1574_s10, 64  ;;  %p1576_p4 = scmp.lt.s32.totalorder %s234_s11, %s1574_s10 }
  0x45   : > { %p1571_p10 = pnand %p1569_p13, %p1788_p7  ;;  %p1577_p6 = scmp.lt.s32.totalorder %s1575_s29, %s1568_s7 }
  0x47   : > { %p1572_p0 = pneg %p1571_p10  ;;  %p1578_p1 = por %p1577_p6, %p1576_p4 }
  0x49   : > { %p1579_p3 = pnand %p1578_p1, %p1572_p0 }
  0x4b   : > { %1582 = shalt.err (!%p1579_p3)
}
  0x4c   : > { %1378 = dma.hbm_to_vmem [thread:$0]  (!%p1767_p5), %s1839_s28, 32, %s234_s11, %s222_s14  }
  0x4d   : > { %s1360_s1 = sshll.u32 %s1679_s26, 13  ;;  %p2344_p10 = scmp.ne.s32.totalorder %s2343_s12, 0 }
  0x4e   : > { %s1594_s18 = scalar_lea.vmem %s1830_s22, 128  ;;  %p1602_p12 = scmp.lt.s32.totalorder %s1830_s22, %s1830_s22 }
  0x4f   : > { %p1585_p13 = pneg %p2344_p10  ;;  %p1595_p8 = scmp.ne.s32.totalorder %s1830_s22, %s1594_s18 }
  0x50   : > { %p1603_p0 = scmp.lt.s32.totalorder %s1594_s18, %s1594_s18 }
  0x51   : > { %p1597_p9 = pnand %p1595_p8, %p1585_p13 }
  0x52   : > { %p1604_p1 = por %p1603_p0, %p1602_p12 }
  0x53   : > { %p1598_p11 = pneg %p1597_p9 }
  0x55   : > { %p1605_p3 = pnand %p1604_p1, %p1598_p11 }
  0x57   : > { %1608 = shalt.err (!%p1605_p3)
}
  0x58   : > { %1374 = dma.hbm_to_vmem [thread:$0]  (!%p2344_p10), %s2320_s3, 128, %s1830_s22, [#allocation11]  }
  0x59   : > { %s1882_s11 = scalar_lea.hbm %s2319_s2, %s1360_s1  ;;  %s1614_s23 = scalar_lea.hbm %s2319_s2, 24576 }
  0x5a   : > { %s1609_s14 = scalar_lea.hbm %s1882_s11, 8192  ;;  %p1615_p10 = scmp.lt.s32.totalorder %s1882_s11, %s2319_s2 }
  0x5b   : > { %p1610_p2 = scmp.ne.s32.totalorder %s1882_s11, %s1609_s14  ;;  %p1616_p13 = scmp.lt.s32.totalorder %s1614_s23, %s1609_s14 }
  0x5d   : > { %p1612_p4 = pnand %p1610_p2, %p1788_p7  ;;  %p1617_p8 = por %p1616_p13, %p1615_p10 }
  0x5f   : > { %p1613_p6 = pneg %p1612_p4 }
  0x61   : > { %p1618_p9 = pnand %p1617_p8, %p1613_p6 }
  0x63   : > { %1621 = shalt.err (!%p1618_p9)
}
  0x64   : > { %s1622_s22 = scalar_lea.vmem %s1809_s20, 8192  ;;  %s1684_s30 = smov [#allocation9]  }
  0x65   : > { %p1623_p11 = scmp.ne.s32.totalorder %s1809_s20, %s1622_s22  ;;  %s1627_s10 = sshll.u32 %s1684_s30, 4  ;;  %s1628_s10 = int_to_ptr.vmem [resolvable:$false] %s1627_s10 }
  0x66   : > { %s1629_s1 = scalar_lea.vmem %s1628_s10, 16384  ;;  %p1630_p1 = scmp.lt.s32.totalorder %s1809_s20, %s1628_s10 }
  0x67   : > { %p1625_p12 = pnand %p1623_p11, %p1788_p7  ;;  %p1631_p3 = scmp.lt.s32.totalorder %s1629_s1, %s1622_s22 }
  0x69   : > { %p1626_p0 = pneg %p1625_p12  ;;  %p1632_p2 = por %p1631_p3, %p1630_p1 }
  0x6b   : > { %p1633_p4 = pnand %p1632_p2, %p1626_p0 }
  0x6d   : > { %1636 = shalt.err (!%p1633_p4)
}
  0x6e   : > { %s1685_s18 = smov 256   ;;  %s1686_s29 = smov 16  }
  0x6f   : > { %1384 = dma.hbm_to_vmem [thread:$0]  (!%p1767_p5), %s1882_s11, 8192, %s1809_s20, %s1782_s17, %s1685_s18, %s1685_s18, %s1686_s29  }
  0x70   : > { %p2345_p7 = scmp.ne.s32.totalorder %s2342_s15, 0 }
  0x72   : > { %283 = sbr.rel (%p2345_p7) target bundleno = 809 (0x329), region = 44 }
  0x77   : > { %s285_s19 = sand.u32 1, %s1671_s24   ;;  %p2346_p6 = scmp.ne.s32.totalorder %s2341_s13, 0 }
  0x78   : > { %s1283_s8 = sshll.u32 %s285_s19, 1  ;;  %s286_s26 = scalar_lea.sflag [#allocation6], %s285_s19 }
  0x79   : > { %s1908_s28 = scalar_lea.vmem [#allocation5], %s1283_s8 }
  0x7a   : > { %1654 = dma.done.wait (%p2346_p6), %s286_s26, 32  }
  0x7b   : > { %1656 = vsyncadd (%p2346_p6), %s286_s26, 4294967264  ;;  %s294_s14 = sand.u32 1, %s1812_s21   ;;  %s1915_s17 = scalar_lea.vmem [#allocation7], %s1283_s8 }
  0x7c   : > { %s295_s9 = scalar_lea.sflag [#allocation8], %s294_s14 }
  0x7d   : > { %1658 = dma.done.wait (%p2346_p6), %s295_s9, 8224  }
  0x7e   : > { %1660 = vsyncadd (%p2346_p6), %s295_s9, 4294959072  ;;  %s1285_s20 = sshll.u32 %s285_s19, 9  ;;  %p2347_p5 = scmp.eq.s32.totalorder %s1812_s21, 0 }
  0x7f   : > { %s1921_s15 = scalar_lea.vmem [#allocation9], %s1285_s20 }
  0x80   : > { %1662 = dma.done.wait (%p2347_p5), [#allocation11], 128   ;;  %p2348_p10 = pmov %p2347_p5 }
  0x81   : > { %p2349_p13 = scmp.ne.s32.totalorder %s1812_s21, 0 }
  0x82   : > { %1664 = vsyncadd (%p2348_p10), [#allocation11], 4294967168 }
  0x83   : > { %351 = sbr.rel (%p2349_p13) target bundleno = 138 (0x8a), region = 64 }
  0x88   : > { %v1687_v0 = vmov 0.0  }
  0x89   : > { %352 = vst [vmem:[#allocation2] sm:$0xff] %v1687_v0  ;;  %353 = vst [vmem:[#allocation3] sm:$0xff] %v1687_v0 }
  0x8a PF: > { %v1930_v1 = vld [vmem:[%s1921_s15 + $0xe4] ss:$16 sps:$4 sm:$0xff]   ;;  %v1933_v2 = vld [vmem:[%s1921_s15 + $0xec] ss:$16 sps:$4 sm:$0xff]   ;;  %v1937_v3 = vld [vmem:[%s1921_s15 + $0xe0] ss:$16 sps:$4 sm:$0xff]   ;;  %v432_v41 = vlaneseq }
  0x8b   : > { %765 = vmatprep.subr.bf16.mxu0 %v1930_v1  ;;  %v1940_v4 = vld [vmem:[%s1921_s15 + $0xe8] ss:$16 sps:$4 sm:$0xff]   ;;  %806 = vmatprep.subr.bf16.mxu1 %v1933_v2  ;;  %v1944_v5 = vld [vmem:[%s1921_s15 + $0xc4] ss:$16 sps:$4 sm:$0xff]   ;;  %v1949_v6 = vld [vmem:[%s1921_s15 + $0xcc] ss:$16 sps:$4 sm:$0xff]  }
  0x8c   : > { %766 = vmatpush1.bf16.msra.mxu0 %v1937_v3  ;;  %807 = vmatpush1.bf16.msra.mxu1 %v1940_v4  ;;  %v1952_v7 = vld [vmem:[%s1921_s15 + $0xc0] ss:$16 sps:$4 sm:$0xff]   ;;  %v1956_v8 = vld [vmem:[%s1921_s15 + $0xc8] ss:$16 sps:$4 sm:$0xff]   ;;  %v1960_v9 = vld [vmem:[%s1921_s15 + $0xa4] ss:$16 sps:$4 sm:$0xff]  }
  0x8d   : > { %767 = vmatprep.subr.bf16.mxu0 %v1944_v5  ;;  %808 = vmatprep.subr.bf16.mxu1 %v1949_v6  ;;  %v1963_v10 = vld [vmem:[%s1921_s15 + $0xac] ss:$16 sps:$4 sm:$0xff]   ;;  %v1966_v11 = vld [vmem:[%s1921_s15 + $0xa0] ss:$16 sps:$4 sm:$0xff]   ;;  %v1969_v12 = vld [vmem:[%s1921_s15 + $0xa8] ss:$16 sps:$4 sm:$0xff]  }
  0x8e   : > { %v1974_v13 = vld [vmem:[%s1921_s15 + $0x84] ss:$16 sps:$4 sm:$0xff]   ;;  %v1979_v14 = vld [vmem:[%s1921_s15 + $0x8c] ss:$16 sps:$4 sm:$0xff]   ;;  %v1982_v15 = vld [vmem:[%s1921_s15 + $0x80] ss:$16 sps:$4 sm:$0xff]  }
  0x8f   : > { %v1987_v16 = vld [vmem:[%s1921_s15 + $0x88] ss:$16 sps:$4 sm:$0xff]   ;;  %v1990_v17 = vld [vmem:[%s1921_s15 + $0x64] ss:$16 sps:$4 sm:$0xff]   ;;  %v1995_v18 = vld [vmem:[%s1921_s15 + $0x6c] ss:$16 sps:$4 sm:$0xff]  }
  0x90   : > { %768 = vmatpush1.bf16.msra.mxu0 %v1952_v7  ;;  %809 = vmatpush1.bf16.msra.mxu1 %v1956_v8  ;;  %v1998_v19 = vld [vmem:[%s1921_s15 + $0x60] ss:$16 sps:$4 sm:$0xff]   ;;  %v2001_v20 = vld [vmem:[%s1921_s15 + $0x68] ss:$16 sps:$4 sm:$0xff]   ;;  %v2006_v21 = vld [vmem:[%s1921_s15 + $0x44] ss:$16 sps:$4 sm:$0xff]  }
  0x91   : > { %769 = vmatprep.subr.bf16.mxu0 %v1960_v9  ;;  %810 = vmatprep.subr.bf16.mxu1 %v1963_v10  ;;  %v2011_v22 = vld [vmem:[%s1921_s15 + $0x4c] ss:$16 sps:$4 sm:$0xff]   ;;  %v2014_v23 = vld [vmem:[%s1921_s15 + $0x40] ss:$16 sps:$4 sm:$0xff]   ;;  %v2019_v24 = vld [vmem:[%s1921_s15 + $0x48] ss:$16 sps:$4 sm:$0xff]  }
  0x92   : > { %v2022_v25 = vld [vmem:[%s1921_s15 + $0x24] ss:$16 sps:$4 sm:$0xff]   ;;  %v2027_v26 = vld [vmem:[%s1921_s15 + $0x2c] ss:$16 sps:$4 sm:$0xff]   ;;  %v2030_v27 = vld [vmem:[%s1921_s15 + $0x20] ss:$16 sps:$4 sm:$0xff]  }
  0x93   : > { %v2033_v28 = vld [vmem:[%s1921_s15 + $0x28] ss:$16 sps:$4 sm:$0xff]   ;;  %v2038_v29 = vld [vmem:[%s1921_s15 + $0x4] ss:$16 sps:$4 sm:$0xff]   ;;  %v2043_v30 = vld [vmem:[%s1921_s15 + $0xc] ss:$16 sps:$4 sm:$0xff]  }
  0x94   : > { %770 = vmatpush1.bf16.msra.mxu0 %v1966_v11  ;;  %811 = vmatpush1.bf16.msra.mxu1 %v1969_v12  ;;  %v2046_v31 = vld [vmem:[%s1921_s15] ss:$16 sps:$4 sm:$0xff]   ;;  %v2051_v32 = vld [vmem:[%s1921_s15 + $0x8] ss:$16 sps:$4 sm:$0xff]   ;;  %v2054_v33 = vld [vmem:[%s1921_s15 + $0x1e4] ss:$16 sps:$4 sm:$0xff]  }
  0x95   : > { %771 = vmatprep.subr.bf16.mxu0 %v1974_v13  ;;  %812 = vmatprep.subr.bf16.mxu1 %v1979_v14  ;;  %v2059_v34 = vld [vmem:[%s1921_s15 + $0x1ec] ss:$16 sps:$4 sm:$0xff]   ;;  %v2062_v35 = vld [vmem:[%s1921_s15 + $0x1e0] ss:$16 sps:$4 sm:$0xff]   ;;  %v2065_v36 = vld [vmem:[%s1921_s15 + $0x1e8] ss:$16 sps:$4 sm:$0xff]  }
  0x96   : > { %v2070_v37 = vld [vmem:[%s1921_s15 + $0x1c4] ss:$16 sps:$4 sm:$0xff]   ;;  %v2075_v38 = vld [vmem:[%s1921_s15 + $0x1cc] ss:$16 sps:$4 sm:$0xff]   ;;  %v1688_v39 = vmov 1966171168  }
  0x97   : > { %v430_v40 = vunpack.c.l.s4 %v1688_v39  ;;  %v2078_v42 = vld [vmem:[%s1921_s15 + $0x1c0] ss:$16 sps:$4 sm:$0xff]   ;;  %v2083_v43 = vld [vmem:[%s1921_s15 + $0x1c8] ss:$16 sps:$4 sm:$0xff]   ;;  %v2086_v44 = vld [vmem:[%s1921_s15 + $0x1a4] ss:$16 sps:$4 sm:$0xff]  }
  0x98   : > { %772 = vmatpush1.bf16.msra.mxu0 %v1982_v15  ;;  %813 = vmatpush1.bf16.msra.mxu1 %v1987_v16  ;;  %v2091_v45 = vld [vmem:[%s1921_s15 + $0x1ac] ss:$16 sps:$4 sm:$0xff]   ;;  %v2093_v47 = vshrl.u32 %v432_v41, 7  ;;  %v2096_v48 = vld [vmem:[%s1921_s15 + $0x1a0] ss:$16 sps:$4 sm:$0xff]   ;;  %p1354_p8 = scmp.ne.s32.totalorder %s1812_s21, 2 }
  0x99   : > { %773 = vmatprep.subr.bf16.mxu0 %v1990_v17  ;;  %814 = vmatprep.subr.bf16.mxu1 %v1995_v18  ;;  %v431_v46 = vunpack.c.0.s8 %v430_v40  ;;  %v2099_v49 = vld [vmem:[%s1921_s15 + $0x1a8] ss:$16 sps:$4 sm:$0xff]   ;;  %v2104_v50 = vld [vmem:[%s1921_s15 + $0x184] ss:$16 sps:$4 sm:$0xff]   ;;  %v2109_v51 = vld [vmem:[%s1921_s15 + $0x18c] ss:$16 sps:$4 sm:$0xff]  }
  0x9a   : > { %2350 = vst [vmem:[#allocation16_spill] sm:$0xff] %v2093_v47  ;;  %v1288_v53 = vld.sshfl [vmem:[%s1908_s28] sm:$0x11 pattern:$0x75316420]  ;;  %s1171_s11 = sld [smem:[#allocation4]] (!%p1354_p8) }
  0x9b   : > { %v2112_v52 = vsub.s32 %v431_v46, %v2093_v47  ;;  %v2118_v54 = vld [vmem:[%s1921_s15 + $0x180] ss:$16 sps:$4 sm:$0xff]   ;;  %v2121_v55 = vld [vmem:[%s1921_s15 + $0x188] ss:$16 sps:$4 sm:$0xff]   ;;  %v428_v56 = vcombine.high %v1288_v53, %v1288_v53  ;;  %v2126_v57 = vld [vmem:[%s1921_s15 + $0x164] ss:$16 sps:$4 sm:$0xff]  }
  0x9c   : > { %774 = vmatpush1.bf16.msra.mxu0 %v1998_v19  ;;  %815 = vmatpush1.bf16.msra.mxu1 %v2001_v20  ;;  %v2129_v58 = vld [vmem:[%s1921_s15 + $0x16c] ss:$16 sps:$4 sm:$0xff]   ;;  %v2135_v60 = vld [vmem:[%s1921_s15 + $0x160] ss:$16 sps:$4 sm:$0xff]   ;;  %v2138_v61 = vld [vmem:[%s1921_s15 + $0x168] ss:$16 sps:$4 sm:$0xff]  }
  0x9d   : > { %775 = vmatprep.subr.bf16.mxu0 %v2006_v21  ;;  %816 = vmatprep.subr.bf16.mxu1 %v2011_v22  ;;  %v442_v59 = vrot.slane %v428_v56, %v2112_v52  ;;  %v2143_v62 = vld [vmem:[%s1921_s15 + $0x144] ss:$16 sps:$4 sm:$0xff]   ;;  %v2146_v63 = vld [vmem:[%s1921_s15 + $0x14c] ss:$16 sps:$4 sm:$0xff]   ;;  %v2151_v0 = vld [vmem:[%s1921_s15 + $0x140] ss:$16 sps:$4 sm:$0xff]  }
  0x9e   : > { %2351 = vst [vmem:[#allocation17_spill] sm:$0xff] %v2146_v63  ;;  %2352 = vst [vmem:[#allocation18_spill] sm:$0xff] %v2151_v0  ;;  %v2154_v39 = vld [vmem:[%s1921_s15 + $0x148] ss:$16 sps:$4 sm:$0xff]   ;;  %v2159_v40 = vld [vmem:[%s1921_s15 + $0x124] ss:$16 sps:$4 sm:$0xff]  }
  0x9f   : > { %797 = vmatprep.mubr.bf16.mxu0 %v442_v59  ;;  %838 = vmatprep.mubr.bf16.mxu1 %v442_v59  ;;  %2353 = vst [vmem:[#allocation19_spill] sm:$0xff] %v2154_v39  ;;  %2354 = vst [vmem:[#allocation20_spill] sm:$0xff] %v2159_v40  ;;  %v2162_v41 = vld [vmem:[%s1921_s15 + $0x12c] ss:$16 sps:$4 sm:$0xff]   ;;  %v2167_v46 = vld [vmem:[%s1921_s15 + $0x120] ss:$16 sps:$4 sm:$0xff]  }
  0xa0   : > { %776 = vmatpush1.bf16.msra.mxu0 %v2014_v23  ;;  %817 = vmatpush1.bf16.msra.mxu1 %v2019_v24  ;;  %2355 = vst [vmem:[#allocation21_spill] sm:$0xff] %v2162_v41  ;;  %v2170_v56 = vld [vmem:[%s1921_s15 + $0x128] ss:$16 sps:$4 sm:$0xff]   ;;  %v2175_v59 = vld [vmem:[%s1921_s15 + $0x104] ss:$16 sps:$4 sm:$0xff]  }
  0xa1   : > { %777 = vmatprep.subr.bf16.mxu0 %v2022_v25  ;;  %818 = vmatprep.subr.bf16.mxu1 %v2027_v26  ;;  %2356 = vst [vmem:[#allocation22_spill] sm:$0xff] %v2170_v56  ;;  %v2178_v47 = vld [vmem:[%s1921_s15 + $0x10c] ss:$16 sps:$4 sm:$0xff]  }
  0xa4   : > { %778 = vmatpush1.bf16.msra.mxu0 %v2030_v27  ;;  %819 = vmatpush1.bf16.msra.mxu1 %v2033_v28 }
  0xa5   : > { %779 = vmatprep.subr.bf16.mxu0 %v2038_v29  ;;  %820 = vmatprep.subr.bf16.mxu1 %v2043_v30 }
  0xa8   : > { %780 = vmatpush1.bf16.msra.mxu0 %v2046_v31  ;;  %821 = vmatpush1.bf16.msra.mxu1 %v2051_v32 }
  0xa9   : > { %781 = vmatprep.subr.bf16.mxu0 %v2054_v33  ;;  %822 = vmatprep.subr.bf16.mxu1 %v2059_v34 }
  0xac   : > { %782 = vmatpush2.bf16.msra.mxu0 %v2062_v35  ;;  %823 = vmatpush2.bf16.msra.mxu1 %v2065_v36 }
  0xad   : > { %783 = vmatprep.subr.bf16.mxu0 %v2070_v37  ;;  %824 = vmatprep.subr.bf16.mxu1 %v2075_v38 }
  0xb0   : > { %784 = vmatpush2.bf16.msra.mxu0 %v2078_v42  ;;  %825 = vmatpush2.bf16.msra.mxu1 %v2083_v43 }
  0xb1   : > { %785 = vmatprep.subr.bf16.mxu0 %v2086_v44  ;;  %826 = vmatprep.subr.bf16.mxu1 %v2091_v45 }
  0xb4   : > { %786 = vmatpush2.bf16.msra.mxu0 %v2096_v48  ;;  %827 = vmatpush2.bf16.msra.mxu1 %v2099_v49 }
  0xb5   : > { %787 = vmatprep.subr.bf16.mxu0 %v2104_v50  ;;  %828 = vmatprep.subr.bf16.mxu1 %v2109_v51 }
  0xb8   : > { %788 = vmatpush2.bf16.msra.mxu0 %v2118_v54  ;;  %829 = vmatpush2.bf16.msra.mxu1 %v2121_v55 }
  0xb9   : > { %789 = vmatprep.subr.bf16.mxu0 %v2126_v57  ;;  %830 = vmatprep.subr.bf16.mxu1 %v2129_v58 }
  0xbc   : > { %790 = vmatpush2.bf16.msra.mxu0 %v2135_v60  ;;  %831 = vmatpush2.bf16.msra.mxu1 %v2138_v61 }
  0xbd   : > { %791 = vmatprep.subr.bf16.mxu0 %v2143_v62  ;;  %832 = vmatprep.subr.bf16.mxu1 %v2146_v63  ;;  %v2181_v63 = vld.sshfl [vmem:[%s1915_s17] sm:$0x11 pattern:$0x75316420] }
  0xc0   : > { %792 = vmatpush2.bf16.msra.mxu0 %v2151_v0  ;;  %833 = vmatpush2.bf16.msra.mxu1 %v2154_v39  ;;  %v2186_v0 = vld [vmem:[%s1921_s15 + $0x100] ss:$16 sps:$4 sm:$0xff]   ;;  %v2189_v39 = vld [vmem:[%s1921_s15 + $0x108] ss:$16 sps:$4 sm:$0xff]  }
  0xc1   : > { %793 = vmatprep.subr.bf16.mxu0 %v2159_v40  ;;  %834 = vmatprep.subr.bf16.mxu1 %v2162_v41  ;;  %v881_v41 = vcombine.high %v2181_v63, %v2181_v63  ;;  %v435_v40 = vrot.slane %v1288_v53, %v2112_v52 }
  0xc4   : > { %794 = vmatpush2.bf16.msra.mxu0 %v2167_v46  ;;  %835 = vmatpush2.bf16.msra.mxu1 %v2170_v56  ;;  %v895_v56 = vrot.slane %v881_v41, %v2112_v52 }
  0xc5   : > { %795 = vmatprep.subr.bf16.mxu0 %v2175_v59  ;;  %836 = vmatprep.subr.bf16.mxu1 %v2178_v47 }
  0xc8   : > { %796 = vmatpush2.bf16.msra.mxu0 %v2186_v0  ;;  %837 = vmatpush2.bf16.msra.mxu1 %v2189_v39 }
  0xc9   : > { %898 = vmatprep.subr.bf16.mxu0 %v1930_v1  ;;  %939 = vmatprep.subr.bf16.mxu1 %v1933_v2  ;;  %v2357_v1 = vld [vmem:[#allocation17_spill] sm:$0xff]  ;;  %v2358_v2 = vld [vmem:[#allocation18_spill] sm:$0xff] }
  0xcb   : > { %798 = vmatmul.mubr.bf16.vlgmr.msra.gmra.mxu0 %v435_v40  ;;  %839 = vmatmul.mubr.bf16.vlgmr.msra.gmra.mxu1 %v435_v40 }
  0xcc   : > { %899 = vmatpush1.bf16.msra.mxu0 %v1937_v3  ;;  %940 = vmatpush1.bf16.msra.mxu1 %v1940_v4  ;;  %v2359_v3 = vld [vmem:[#allocation19_spill] sm:$0xff]  ;;  %v2360_v4 = vld [vmem:[#allocation20_spill] sm:$0xff] }
  0xcd   : > { %900 = vmatprep.subr.bf16.mxu0 %v1944_v5  ;;  %941 = vmatprep.subr.bf16.mxu1 %v1949_v6  ;;  %v2361_v5 = vld [vmem:[#allocation21_spill] sm:$0xff]  ;;  %v2362_v6 = vld [vmem:[#allocation22_spill] sm:$0xff] }
  0xce   : > { %930 = vmatprep.mubr.bf16.mxu0 %v895_v56  ;;  %971 = vmatprep.mubr.bf16.mxu1 %v895_v56 }
  0xd0   : > { %901 = vmatpush1.bf16.msra.mxu0 %v1952_v7  ;;  %942 = vmatpush1.bf16.msra.mxu1 %v1956_v8  ;;  %v888_v7 = vrot.slane %v2181_v63, %v2112_v52  ;;  %v1689_v8 = vmov 1983009808  }
  0xd1   : > { %902 = vmatprep.subr.bf16.mxu0 %v1960_v9  ;;  %943 = vmatprep.subr.bf16.mxu1 %v1963_v10  ;;  %v854_v9 = vunpack.c.l.s4 %v1689_v8 }
  0xd3   : > { %v855_v10 = vunpack.c.0.s8 %v854_v9 }
  0xd4   : > { %903 = vmatpush1.bf16.msra.mxu0 %v1966_v11  ;;  %944 = vmatpush1.bf16.msra.mxu1 %v1969_v12 }
  0xd5   : > { %904 = vmatprep.subr.bf16.mxu0 %v1974_v13  ;;  %945 = vmatprep.subr.bf16.mxu1 %v1979_v14  ;;  %v2363_v13 = vld [vmem:[#allocation16_spill] sm:$0xff] }
  0xd6   : > { %v2266_v14 = vsub.s32 %v855_v10, %v2363_v13 }
  0xd8   : > { %905 = vmatpush1.bf16.msra.mxu0 %v1982_v15  ;;  %946 = vmatpush1.bf16.msra.mxu1 %v1987_v16 }
  0xd9   : > { %906 = vmatprep.subr.bf16.mxu0 %v1990_v17  ;;  %947 = vmatprep.subr.bf16.mxu1 %v1995_v18 }
  0xdc   : > { %907 = vmatpush1.bf16.msra.mxu0 %v1998_v19  ;;  %948 = vmatpush1.bf16.msra.mxu1 %v2001_v20 }
  0xdd   : > { %908 = vmatprep.subr.bf16.mxu0 %v2006_v21  ;;  %949 = vmatprep.subr.bf16.mxu1 %v2011_v22 }
  0xe0   : > { %909 = vmatpush1.bf16.msra.mxu0 %v2014_v23  ;;  %950 = vmatpush1.bf16.msra.mxu1 %v2019_v24  ;;  %v418_v23 = vld [vmem:[#allocation2] sm:$0xff] }
  0xe1   : > { %910 = vmatprep.subr.bf16.mxu0 %v2022_v25  ;;  %951 = vmatprep.subr.bf16.mxu1 %v2027_v26 }
  0xe4   : > { %911 = vmatpush1.bf16.msra.mxu0 %v2030_v27  ;;  %952 = vmatpush1.bf16.msra.mxu1 %v2033_v28 }
  0xe5   : > { %912 = vmatprep.subr.bf16.mxu0 %v2038_v29  ;;  %953 = vmatprep.subr.bf16.mxu1 %v2043_v30 }
  0xe8   : > { %913 = vmatpush1.bf16.msra.mxu0 %v2046_v31  ;;  %954 = vmatpush1.bf16.msra.mxu1 %v2051_v32 }
  0xe9   : > { %914 = vmatprep.subr.bf16.mxu0 %v2054_v33  ;;  %955 = vmatprep.subr.bf16.mxu1 %v2059_v34 }
  0xec   : > { %915 = vmatpush2.bf16.msra.mxu0 %v2062_v35  ;;  %956 = vmatpush2.bf16.msra.mxu1 %v2065_v36 }
  0xed   : > { %916 = vmatprep.subr.bf16.mxu0 %v2070_v37  ;;  %957 = vmatprep.subr.bf16.mxu1 %v2075_v38  ;;  %v871_v38 = vld [vmem:[#allocation3] sm:$0xff] }
  0xf0   : > { %917 = vmatpush2.bf16.msra.mxu0 %v2078_v42  ;;  %958 = vmatpush2.bf16.msra.mxu1 %v2083_v43 }
  0xf1   : > { %918 = vmatprep.subr.bf16.mxu0 %v2086_v44  ;;  %959 = vmatprep.subr.bf16.mxu1 %v2091_v45 }
  0xf4   : > { %919 = vmatpush2.bf16.msra.mxu0 %v2096_v48  ;;  %960 = vmatpush2.bf16.msra.mxu1 %v2099_v49 }
  0xf5   : > { %920 = vmatprep.subr.bf16.mxu0 %v2104_v50  ;;  %961 = vmatprep.subr.bf16.mxu1 %v2109_v51 }
  0xf8   : > { %921 = vmatpush2.bf16.msra.mxu0 %v2118_v54  ;;  %962 = vmatpush2.bf16.msra.mxu1 %v2121_v55 }
  0xf9   : > { %922 = vmatprep.subr.bf16.mxu0 %v2126_v57  ;;  %963 = vmatprep.subr.bf16.mxu1 %v2129_v58 }
  0xfc   : > { %923 = vmatpush2.bf16.msra.mxu0 %v2135_v60  ;;  %964 = vmatpush2.bf16.msra.mxu1 %v2138_v61 }
  0xfd   : > { %924 = vmatprep.subr.bf16.mxu0 %v2143_v62  ;;  %965 = vmatprep.subr.bf16.mxu1 %v2357_v1 }
 0x100   : > { %925 = vmatpush2.bf16.msra.mxu0 %v2358_v2  ;;  %966 = vmatpush2.bf16.msra.mxu1 %v2359_v3 }
 0x101   : > { %926 = vmatprep.subr.bf16.mxu0 %v2360_v4  ;;  %967 = vmatprep.subr.bf16.mxu1 %v2361_v5 }
 0x104   : > { %927 = vmatpush2.bf16.msra.mxu0 %v2167_v46  ;;  %968 = vmatpush2.bf16.msra.mxu1 %v2362_v6 }
 0x105   : > { %928 = vmatprep.subr.bf16.mxu0 %v2175_v59  ;;  %969 = vmatprep.subr.bf16.mxu1 %v2178_v47 }
 0x108   : > { %929 = vmatpush2.bf16.msra.mxu0 %v2186_v0  ;;  %970 = vmatpush2.bf16.msra.mxu1 %v2189_v39 }
 0x10b   : > { %931 = vmatmul.mubr.bf16.vlgmr.msra.gmra.mxu0 %v888_v7  ;;  %972 = vmatmul.mubr.bf16.vlgmr.msra.gmra.mxu1 %v888_v7 }
 0x18b   : > { %v799_v11 = vpop.f32.mrf.mxu0  ;;  %v840_v12 = vpop.f32.mrf.mxu1 }
 0x18d   : > { %v801_v15 = vpop.f32.mrf.mxu0  ;;  %v842_v16 = vpop.f32.mrf.mxu1 }
 0x18e   : > { %v851_v17 = vcombine.low %v799_v11, %v801_v15  ;;  %v852_v18 = vcombine.low %v840_v12, %v842_v16 }
 0x18f   : > { %v803_v19 = vpop.f32.mrf.mxu0  ;;  %v844_v20 = vpop.f32.mrf.mxu1 }
 0x190   : > { %v859_v21 = vrot.slane %v851_v17, %v2266_v14  ;;  %v866_v22 = vrot.slane %v852_v18, %v2266_v14 }
 0x191   : > { %v804_v24 = vpop.f32.mrf.mxu0  ;;  %v845_v25 = vpop.f32.mrf.mxu1 }
 0x192   : > { %v867_v26 = vcombine.low %v859_v21, %v866_v22 }
 0x194   : > { %v869_v27 = vadd.f32 %v867_v26, %v418_v23 }
 0x196   : > { %870 = vst [vmem:[#allocation2] sm:$0xff] %v869_v27 }
 0x1cb   : > { %v932_v28 = vpop.f32.mrf.mxu0  ;;  %v973_v29 = vpop.f32.mrf.mxu1 }
 0x1cd   : > { %v934_v30 = vpop.f32.mrf.mxu0  ;;  %v975_v31 = vpop.f32.mrf.mxu1 }
 0x1ce   : > { %v984_v32 = vcombine.low %v932_v28, %v934_v30  ;;  %v985_v33 = vcombine.low %v973_v29, %v975_v31 }
 0x1cf   : > { %v936_v34 = vpop.f32.mrf.mxu0  ;;  %v977_v35 = vpop.f32.mrf.mxu1 }
 0x1d0   : > { %v992_v36 = vrot.slane %v984_v32, %v2266_v14  ;;  %v999_v37 = vrot.slane %v985_v33, %v2266_v14 }
 0x1d1   : > { %v937_v42 = vpop.f32.mrf.mxu0  ;;  %v978_v43 = vpop.f32.mrf.mxu1 }
 0x1d2   : > { %v1000_v44 = vcombine.low %v992_v36, %v999_v37  ;;  %1007 = sbr.rel (%p1354_p8) target bundleno = 809 (0x329), region = 68 }
 0x1d4   : > { %v1002_v45 = vadd.f32 %v1000_v44, %v871_v38 }
 0x1d6   : > { %1003 = vst [vmem:[#allocation3] sm:$0xff] %v1002_v45 }
 0x1d7   : > { %v1008_v47 = vld [vmem:[#allocation2] sm:$0xff]  ;;  %vm1033_vm0 = vcmask 1041408   ;;  %v1690_v11 = vmov 269488144   ;;  %v1101_v37 = vld [vmem:[#allocation10] sm:$0xff]  ;;  %vm1174_vm1 = vcmask 1024  }
 0x1d8   : > { %v1010_v49 = vmul.f32 %v1008_v47, %v1008_v47  ;;  %v1047_v12 = vunpack.c.l.s4 %v1690_v11  ;;  %v2364_v15 = vld [vmem:[#allocation16_spill] sm:$0xff] }
 0x1d9   : > { %v1107_v16 = vsub.s32 0, %v2364_v15  ;;  %v1111_v17 = vsub.s32 1, %v2364_v15  ;;  %v1115_v18 = vsub.s32 2, %v2364_v15  ;;  %v1119_v19 = vsub.s32 3, %v2364_v15  ;;  %v1103_v20 = vld [vmem:[%s2321_s4] sm:$0xf] }
 0x1da   : > { %v1012_v51 = vcombine.high %v1010_v49, %v1010_v49  ;;  %v1019_v52 = vrot.slane %v1010_v49, %v2266_v14  ;;  %v1048_v13 = vunpack.c.0.s8 %v1047_v12 }
 0x1db   : > { %v1108_v22 = vrot.slane %v1103_v20, %v1107_v16  ;;  %v1112_v23 = vrot.slane %v1103_v20, %v1111_v17  ;;  %v1116_v24 = vrot.slane %v1103_v20, %v1115_v18  ;;  %v1120_v25 = vrot.slane %v1103_v20, %v1119_v19 }
 0x1dc   : > { %v1026_v55 = vrot.slane %v1012_v51, %v2266_v14  ;;  %v1027_v57 = vcombine.high %v1019_v52, %v1019_v52  ;;  %v1034_v58 = vsel %vm1033_vm0, %v1019_v52, 0.0  ;;  %v1051_v21 = vsub.s32 %v1048_v13, %v2364_v15 }
 0x1dd   : > { %v1009_v48 = vld [vmem:[#allocation3] sm:$0xff]  ;;  %v1121_v28 = vcombine.low %v1108_v22, %v1112_v23  ;;  %v1122_v29 = vcombine.low %v1116_v24, %v1120_v25 }
 0x1de   : > { %v1055_v50 = vmul.f32 %v1009_v48, %v1009_v48  ;;  %v1028_v63 = vcombine.high %v1026_v55, %v1026_v55  ;;  %v1035_v0 = vsel %vm1033_vm0, %v1027_v57, 0.0  ;;  %v1037_v39 = vsel %vm1033_vm0, %v1026_v55, 0.0 }
 0x1df   : > { %v1036_v41 = vadd.f32 %v1035_v0, %v1034_v58  ;;  %v1129_v34 = vrot.slane %v1121_v28, %v2266_v14  ;;  %v1136_v35 = vrot.slane %v1122_v29, %v2266_v14 }
 0x1e0   : > { %v1057_v53 = vcombine.high %v1055_v50, %v1055_v50  ;;  %v1064_v54 = vrot.slane %v1055_v50, %v2266_v14  ;;  %v1039_v59 = vsel %vm1033_vm0, %v1028_v63, 0.0 }
 0x1e1   : > { %v1038_v2 = vadd.f32 %v1037_v39, %v1036_v41  ;;  %v1137_v42 = vcombine.low %v1129_v34, %v1136_v35 }
 0x1e2   : > { %v1071_v60 = vrot.slane %v1057_v53, %v2266_v14  ;;  %v1072_v61 = vcombine.high %v1064_v54, %v1064_v54  ;;  %v1078_v62 = vsel %vm1033_vm0, %v1064_v54, 0.0 }
 0x1e3   : > { %v1040_v5 = vadd.f32 %v1039_v59, %v1038_v2 }
 0x1e4   : > { %v1073_v40 = vcombine.high %v1071_v60, %v1071_v60  ;;  %v1079_v46 = vsel %vm1033_vm0, %v1072_v61, 0.0  ;;  %v1081_v56 = vsel %vm1033_vm0, %v1071_v60, 0.0  ;;  %v1172_v60 = vstv %s1171_s11 }
 0x1e5   : > { %v1080_v1 = vadd.f32 %v1079_v46, %v1078_v62  ;;  %1041 = vadd.xlane.f32.xlu0 %v1040_v5 }
 0x1e6   : > { %v1083_v4 = vsel %vm1033_vm0, %v1073_v40, 0.0 }
 0x1e7   : > { %v1082_v3 = vadd.f32 %v1081_v56, %v1080_v1 }
 0x1e9   : > { %v1084_v6 = vadd.f32 %v1083_v4, %v1082_v3 }
 0x1eb   : > { %1085 = vadd.xlane.f32.xlu0 %v1084_v6 }
 0x26e   : > { %v1042_v7 = vpop.xlane.xlu0 %1041 }
 0x26f   : > { %v1043_v8 = vmax.f32 %v1042_v7, 1e-24 }
 0x271   : > { %1523 = vrsqrt.f32 %v1043_v8 }
 0x274   : > { %v1086_v9 = vpop.xlane.xlu0 %1085 }
 0x275   : > { %v1087_v10 = vmax.f32 %v1086_v9, 1e-24 }
 0x277   : > { %1525 = vrsqrt.f32 %v1087_v10 }
 0x27e   : > { %v1524_v26 = vpop.eup %1523 }
 0x27f   : > { %v1052_v27 = vrot.slane %v1524_v26, %v1051_v21 }
 0x281   : > { %v1054_v32 = vmul.f32 %v1052_v27, %v1008_v47 }
 0x284   : > { %v1526_v30 = vpop.eup %1525 }
 0x285   : > { %v1096_v31 = vrot.slane %v1526_v30, %v1051_v21 }
 0x287   : > { %v1098_v33 = vmul.f32 %v1096_v31, %v1009_v48 }
 0x289   : > { %v1099_v36 = vsub.f32 %v1054_v32, %v1098_v33 }
 0x28b   : > { %v1100_v38 = vand.u32 2147483647, %v1099_v36 }
 0x28d   : > { %v1102_v43 = vmul.f32 %v1101_v37, %v1100_v38 }
 0x28f   : > { %v1139_v44 = vmul.f32 %v1137_v42, %v1102_v43 }
 0x291   : > { %v1141_v45 = vcombine.high %v1139_v44, %v1139_v44  ;;  %v1148_v49 = vrot.slane %v1139_v44, %v2266_v14 }
 0x293   : > { %v1155_v50 = vrot.slane %v1141_v45, %v2266_v14  ;;  %v1156_v51 = vcombine.high %v1148_v49, %v1148_v49  ;;  %v1162_v47 = vsel %vm1033_vm0, %v1148_v49, 0.0 }
 0x295   : > { %v1157_v52 = vcombine.high %v1155_v50, %v1155_v50  ;;  %v1163_v48 = vsel %vm1033_vm0, %v1156_v51, 0.0  ;;  %v1165_v54 = vsel %vm1033_vm0, %v1155_v50, 0.0 }
 0x296   : > { %v1164_v53 = vadd.f32 %v1163_v48, %v1162_v47 }
 0x297   : > { %v1167_v57 = vsel %vm1033_vm0, %v1157_v52, 0.0 }
 0x298   : > { %v1166_v55 = vadd.f32 %v1165_v54, %v1164_v53 }
 0x29a   : > { %v1168_v58 = vadd.f32 %v1167_v57, %v1166_v55 }
 0x29c   : > { %1169 = vadd.xlane.f32.xlu1 %v1168_v58 }
 0x325   : > { %v1170_v61 = vpop.xlane.xlu1 %1169 }
 0x326   : > { %v1173_v62 = vadd.f32 %v1172_v60, %v1170_v61 }
 0x328   : > { %1175 = vst.msk [vmem:[%s2323_s6] sm:$0x3] %vm1174_vm1, %v1173_v62 }
 0x329 PF: > { %s2365_s27 = sld [smem:[#allocation15_spill]]  ;;  %p21_p9 = scmp.ge.s32.totalorder %s1750_s5, 5  }
 0x32a   : > { %s2366_s23 = smov %s1671_s24  ;;  %s2367_s24 = smov %s1675_s25 }
 0x32b   : > { %s2369_s26 = smov %s1750_s5  ;;  %23 = sbr.rel (!%p21_p9) target bundleno = 9 (0x9), region = 116 }
 0x32f   : > { %s2368_s25 = smov %s2365_s27 }
 0x330   :  { %1187 = vsyncpa [#allocation6], 1 }
 0x331   :  { %1189 = vsyncpa [#allocation6 + $0x1], 1 }
 0x332   :  { %1190 = vsyncpa [#allocation8], 1 }
 0x333   :  { %1192 = vsyncpa [#allocation8 + $0x1], 1 }
 0x334   :  { %1193 = vsyncpa [#allocation11], 1 }

</bundles_post_ra>
